<compile_context>
chip_gen: v6e
topology: v6e:2x2x1
jax: 0.10.0
libtpu: 0.0.40
codegen_flags: <defaults>
</compile_context>

<pallas_src>
import jax
import jax.numpy as jnp
import numpy as np
from jax.experimental import pallas as pl
from jax.experimental.pallas import tpu as pltpu

WIN = 11
SIGMA = 1.5
C1 = 0.01 ** 2
C2 = 0.03 ** 2


def _gaussian_1d(win, sigma):
    x = np.arange(win, dtype=np.float32) - (win - 1) / 2.0
    g = np.exp(-(x ** 2) / (2.0 * sigma ** 2))
    return (g / g.sum()).astype(np.float32)


def _blur_matrix(size, win, sigma):
    """M such that M @ x == 1-D zero-padded gaussian conv along the first axis."""
    g = _gaussian_1d(win, sigma)
    pad = win // 2
    m = np.zeros((size, size), dtype=np.float32)
    for i in range(size):
        for k in range(size):
            u = k - i + pad
            if 0 <= u < win:
                m[i, k] = g[u]
    return m


def _choose_tb(b, w, h, cap=512):
    """Planes packed per block along the lane axis.

    Prefer a packed lane width that is a multiple of 256 (fills the 256-wide
    MXU on v6e/v7x), else a multiple of 128 (full vreg lanes / native v5e MXU
    width), bounded by `cap` so the block-diagonal col-blur matrix (tbw, tbw)
    stays small.
    """
    if h % 8 != 0:
        # Single full-array block (block_shape == array dims, always legal).
        # TODO(synk): pad H to a multiple of 8 instead for realistic shapes.
        return b
    best128 = best256 = None
    for tb in range(1, b + 1):
        if b % tb:
            continue
        lw = tb * w
        if lw > cap:
            continue
        if lw % 256 == 0:
            best256 = tb
        if lw % 128 == 0:
            best128 = tb
    if best256 is not None:
        return best256
    if best128 is not None:
        return best128
    # Fallback: largest divisor under the cap.  The packed lane width equals
    # the full array lane width, so legality holds; perf may be sub-par.
    # TODO(synk): for large non-128-aligned W, pad W to 128 instead.
    best = 1
    for tb in range(1, b + 1):
        if b % tb == 0 and tb * w <= cap:
            best = tb
    return best


def _make_kernel(h, weights, inv_n):
    w0 = float(weights[0])
    w1 = float(weights[1])
    w2 = float(weights[2])

    def kernel(x_ref, y_ref, bdwt_ref, bh_ref, out_ref, acc_ref):
        i = pl.program_id(1)  # inner (sequential / "arbitrary") axis

        @pl.when(i == 0)
        def _():
            acc_ref[...] = jnp.zeros_like(acc_ref)

        x = x_ref[...]                      # (H, TB*W) lane-packed planes
        y = y_ref[...]
        d = x - y

        # MSE/MAE part first so d (and soon x, y) are dead before the SSIM
        # temporaries become live.
        acc_ref[...] += w0 * (d * d) + w1 * jnp.abs(d)

        # --- fused separable Gaussian blur of (x, y, xx, yy, xy).
        # Column blur: one matmul on the packed 5-operand stack with the
        # block-diagonal per-plane blur matrix (contraction width = TB*W).
        s = jnp.concatenate([x, y, x * x, y * y, x * y], axis=0)    # (5H, TBW)
        t = jnp.dot(s, bdwt_ref[...], preferred_element_type=jnp.float32)

        # Row blur: apply the (H, H) blur to each operand chunk directly
        # (no kron(eye(5), bh) -> 5x fewer FLOPs, 25x smaller matrix).
        bh = bh_ref[...]
        mu_x = jnp.dot(bh, t[0 * h:1 * h], preferred_element_type=jnp.float32)
        mu_y = jnp.dot(bh, t[1 * h:2 * h], preferred_element_type=jnp.float32)
        e_xx = jnp.dot(bh, t[2 * h:3 * h], preferred_element_type=jnp.float32)
        e_yy = jnp.dot(bh, t[3 * h:4 * h], preferred_element_type=jnp.float32)
        e_xy = jnp.dot(bh, t[4 * h:5 * h], preferred_element_type=jnp.float32)

        mu_x2 = mu_x * mu_x
        mu_y2 = mu_y * mu_y
        mu_xy = mu_x * mu_y
        sigma_x = e_xx - mu_x2
        sigma_y = e_yy - mu_y2
        sigma_xy = e_xy - mu_xy

        num = (2.0 * mu_xy + C1) * (2.0 * sigma_xy + C2)
        den = (mu_x2 + mu_y2 + C1) * (sigma_x + sigma_y + C2)
        ssim_map = num * pl.reciprocal(den, approx=True)

        acc_ref[...] += (-w2) * ssim_map

        @pl.when(i == pl.num_programs(1) - 1)
        def _():
            # Per-split partial of (w0*mse + w1*mae - w2*mean_ssim); the
            # wrapper sums the splits and adds the constant +w2.
            partial = jnp.sum(acc_ref[...]) * inv_n
            out_ref[...] = jnp.broadcast_to(partial, (8, 128)).astype(jnp.float32)

    return kernel


def combined_loss(output, target, weights):
    """output/target: NCHW float arrays; weights: 3-tuple of floats."""
    n_, c_, h, w = output.shape
    b = n_ * c_

    tb = _choose_tb(b, w, h)
    nb = b // tb
    tbw = tb * w

    # Split the plane-blocks across a leading "parallel" axis so v7x's second
    # TensorCore can take half; on 1-TC chips this axis just iterates.
    nsplit = 2 if (nb >= 2 and nb % 2 == 0) else 1
    nb_inner = nb // nsplit

    def pack(a):
        # (N,C,H,W) -> (nb*H, TB*W): plane-blocks stacked on sublanes,
        # planes of a block packed along the lane axis.
        a = jnp.asarray(a, jnp.float32).reshape(nb, tb, h, w)
        a = jnp.transpose(a, (0, 2, 1, 3))            # (nb, H, TB, W)
        return a.reshape(nb * h, tbw)

    xp = pack(output)
    yp = pack(target)

    bh = jnp.asarray(_blur_matrix(h, WIN, SIGMA))                       # (H, H)
    bdwt = jnp.asarray(
        np.kron(np.eye(tb, dtype=np.float32), _blur_matrix(w, WIN, SIGMA).T)
    )                                                                   # (TBW, TBW)

    inv_n = 1.0 / float(b * h * w)
    kernel = _make_kernel(h, weights, inv_n)

    grid_spec = pltpu.PrefetchScalarGridSpec(
        num_scalar_prefetch=0,
        grid=(nsplit, nb_inner),
        in_specs=[
            pl.BlockSpec((h, tbw), lambda j, i: (j * nb_inner + i, 0)),   # x block
            pl.BlockSpec((h, tbw), lambda j, i: (j * nb_inner + i, 0)),   # y block
            pl.BlockSpec((tbw, tbw), lambda j, i: (0, 0)),                # col-blur^T
            pl.BlockSpec((h, h), lambda j, i: (0, 0)),                    # row-blur
        ],
        # Lane-dense (8,128) partial per split: unmasked stores, legal tiling.
        out_specs=pl.BlockSpec((8, 128), lambda j, i: (j, 0)),
        scratch_shapes=[pltpu.VMEM((h, tbw), jnp.float32)],
    )

    # Derive the VMEM budget from the actual buffer footprint (double-buffered
    # inputs + resident blur matrices + accumulator), capped for v7x (64 MiB).
    block_bytes = h * tbw * 4
    vmem_bytes = (
        2 * 2 * block_bytes            # x, y (double-buffered)
        + 2 * tbw * tbw * 4            # bdwt
        + 2 * h * h * 4                # bh
        + 2 * 8 * 128 * 4              # out partials
        + block_bytes                  # acc scratch
    )
    vmem_limit = min(max(int(vmem_bytes * 1.5) + (1 << 20), 4 << 20), 48 << 20)

    out = pl.pallas_call(
        kernel,
        out_shape=jax.ShapeDtypeStruct((nsplit * 8, 128), jnp.float32),
        grid_spec=grid_spec,
        compiler_params=pltpu.CompilerParams(
            dimension_semantics=("parallel", "arbitrary"),
            vmem_limit_bytes=vmem_limit,
        ),
    )(xp, yp, bdwt, bh)

    partials = out[0::8, 0]                 # one partial per split
    return jnp.sum(partials) + float(weights[2])


def combined_loss_ref(output, target, weights):
    """Pure-JAX reference with identical SSIM convention (for validation)."""
    n_, c_, h, w = output.shape
    x = output.reshape(n_ * c_, h, w).astype(jnp.float32)
    y = target.reshape(n_ * c_, h, w).astype(jnp.float32)
    bh = jnp.asarray(_blur_matrix(h, WIN, SIGMA))
    bw = jnp.asarray(_blur_matrix(w, WIN, SIGMA))

    def blur(p):
        return jnp.einsum("hi,bij,wj->bhw", bh, p, bw)

    d = x - y
    mse = jnp.mean(d * d)
    mae = jnp.mean(jnp.abs(d))
    mu_x, mu_y = blur(x), blur(y)
    mu_x2, mu_y2, mu_xy = mu_x * mu_x, mu_y * mu_y, mu_x * mu_y
    sigma_x = blur(x * x) - mu_x2
    sigma_y = blur(y * y) - mu_y2
    sigma_xy = blur(x * y) - mu_xy
    ssim_map = ((2 * mu_xy + C1) * (2 * sigma_xy + C2)) / (
        (mu_x2 + mu_y2 + C1) * (sigma_x + sigma_y + C2)
    )
    ssim_val = jnp.mean(ssim_map)
    wt = jnp.asarray(weights, dtype=jnp.float32)
    return wt[0] * mse + wt[1] * mae + wt[2] * (1.0 - ssim_val)


if __name__ == "__main__":
    key = jax.random.PRNGKey(0)
    k1, k2 = jax.random.split(key)
    # N=2, C=4, H=W=16 — small NCHW inputs, values in [0, 1] (SSIM data range 1).
    output = jax.random.uniform(k1, (2, 4, 16, 16), dtype=jnp.float32)
    target = jax.random.uniform(k2, (2, 4, 16, 16), dtype=jnp.float32)
    weights = (0.5, 0.3, 0.2)  # deterministic "module params"

    loss = combined_loss(output, target, weights)
    loss = jax.block_until_ready(loss)

    ref = combined_loss_ref(output, target, weights)
    np.testing.assert_allclose(float(loss), float(ref), rtol=1e-3, atol=1e-3)
    print("KERNEL_OK")
</pallas_src>

<mosaic_0001>
module attributes {stable_mosaic.version = 11 : i64} {
  func.func @kernel(%arg0: i32, %arg1: i32, %arg2: memref<16x128xf32, #tpu.memory_space<vmem>>, %arg3: memref<16x128xf32, #tpu.memory_space<vmem>>, %arg4: memref<128x128xf32, #tpu.memory_space<vmem>>, %arg5: memref<16x16xf32, #tpu.memory_space<vmem>>, %arg6: memref<8x128xf32, #tpu.memory_space<vmem>>, %arg7: memref<16x128xf32, #tpu.memory_space<vmem>>) attributes {dimension_semantics = [#tpu.dimension_semantics<parallel>, #tpu.dimension_semantics<arbitrary>], iteration_bounds = array<i64: 1, 1>, scalar_prefetch = 0 : i64, scratch_operands = 1 : i64, tpu.core_type = #tpu.core_type<tc>, window_params = [{transform_indices = @transform_0, window_bounds = array<i64: 16, 128>}, {transform_indices = @transform_1, window_bounds = array<i64: 16, 128>}, {pipeline_mode = #tpu.pipeline_mode<synchronous>, transform_indices = @transform_2, window_bounds = array<i64: 128, 128>}, {pipeline_mode = #tpu.pipeline_mode<synchronous>, transform_indices = @transform_3, window_bounds = array<i64: 16, 16>}, {transform_indices = @transform_4, window_bounds = array<i64: 8, 128>}]} {
    %c0_i32 = arith.constant 0 : i32
    %0 = arith.cmpi eq, %arg1, %c0_i32 : i32
    %1 = arith.extui %0 : i1 to i32
    %c0_i32_0 = arith.constant 0 : i32
    %2 = arith.cmpi ne, %1, %c0_i32_0 : i32
    scf.if %2 {
      %cst_32 = arith.constant 0.000000e+00 : f32
      %65 = vector.broadcast %cst_32 : f32 to vector<16x128xf32>
      %c0_33 = arith.constant 0 : index
      %c0_34 = arith.constant 0 : index
      %66 = vector.load %arg7[%c0_33, %c0_34] : memref<16x128xf32, #tpu.memory_space<vmem>>, vector<16x128xf32>
      tpu.vector_store %arg7[%c0_33, %c0_34], %65 {strides = array<i32>} : memref<16x128xf32, #tpu.memory_space<vmem>>, vector<16x128xf32>,
    } else {
    }
    %c0 = arith.constant 0 : index
    %c0_1 = arith.constant 0 : index
    %3 = vector.load %arg2[%c0, %c0_1] : memref<16x128xf32, #tpu.memory_space<vmem>>, vector<16x128xf32>
    %c0_2 = arith.constant 0 : index
    %c0_3 = arith.constant 0 : index
    %4 = vector.load %arg3[%c0_2, %c0_3] : memref<16x128xf32, #tpu.memory_space<vmem>>, vector<16x128xf32>
    %5 = arith.subf %3, %4 : vector<16x128xf32>
    %c0_4 = arith.constant 0 : index
    %c0_5 = arith.constant 0 : index
    %6 = vector.load %arg7[%c0_4, %c0_5] : memref<16x128xf32, #tpu.memory_space<vmem>>, vector<16x128xf32>
    %7 = arith.mulf %5, %5 : vector<16x128xf32>
    %cst = arith.constant 5.000000e-01 : f32
    %8 = vector.broadcast %cst : f32 to vector<16x128xf32>
    %9 = arith.mulf %8, %7 : vector<16x128xf32>
    %10 = math.absf %5 : vector<16x128xf32>
    %cst_6 = arith.constant 3.000000e-01 : f32
    %11 = vector.broadcast %cst_6 : f32 to vector<16x128xf32>
    %12 = arith.mulf %11, %10 : vector<16x128xf32>
    %13 = arith.addf %9, %12 : vector<16x128xf32>
    %14 = arith.addf %6, %13 : vector<16x128xf32>
    %c0_7 = arith.constant 0 : index
    %c0_8 = arith.constant 0 : index
    %15 = vector.load %arg7[%c0_7, %c0_8] : memref<16x128xf32, #tpu.memory_space<vmem>>, vector<16x128xf32>
    tpu.vector_store %arg7[%c0_7, %c0_8], %14 {strides = array<i32>} : memref<16x128xf32, #tpu.memory_space<vmem>>, vector<16x128xf32>,
    %16 = arith.mulf %3, %3 : vector<16x128xf32>
    %17 = arith.mulf %4, %4 : vector<16x128xf32>
    %18 = arith.mulf %3, %4 : vector<16x128xf32>
    %19 = tpu.concatenate %3, %4, %16, %17, %18 in 0 : vector<16x128xf32>, vector<16x128xf32>, vector<16x128xf32>, vector<16x128xf32>, vector<16x128xf32> -> vector<80x128xf32>
    %c0_9 = arith.constant 0 : index
    %c0_10 = arith.constant 0 : index
    %20 = vector.load %arg4[%c0_9, %c0_10] : memref<128x128xf32, #tpu.memory_space<vmem>>, vector<128x128xf32>
    %cst_11 = arith.constant dense<0.000000e+00> : vector<80x128xf32>
    %21 = tpu.matmul %19, %20, %cst_11 {dimension_numbers = #tpu.dot_dimension_numbers<[1], [0], [0], [1], [0, 0, 1, 1], [], []>} : vector<80x128xf32>, vector<128x128xf32>, vector<80x128xf32> -> vector<80x128xf32>
    %c0_12 = arith.constant 0 : index
    %c0_13 = arith.constant 0 : index
    %22 = vector.load %arg5[%c0_12, %c0_13] : memref<16x16xf32, #tpu.memory_space<vmem>>, vector<16x16xf32>
    %23 = vector.extract_strided_slice %21 {offsets = [0, 0], sizes = [16, 128], strides = [1, 1]} : vector<80x128xf32> to vector<16x128xf32>
    %cst_14 = arith.constant dense<0.000000e+00> : vector<16x128xf32>
    %24 = tpu.matmul %22, %23, %cst_14 {dimension_numbers = #tpu.dot_dimension_numbers<[1], [0], [0], [1], [0, 0, 1, 1], [], []>} : vector<16x16xf32>, vector<16x128xf32>, vector<16x128xf32> -> vector<16x128xf32>
    %25 = vector.extract_strided_slice %21 {offsets = [16, 0], sizes = [16, 128], strides = [1, 1]} : vector<80x128xf32> to vector<16x128xf32>
    %cst_15 = arith.constant dense<0.000000e+00> : vector<16x128xf32>
    %26 = tpu.matmul %22, %25, %cst_15 {dimension_numbers = #tpu.dot_dimension_numbers<[1], [0], [0], [1], [0, 0, 1, 1], [], []>} : vector<16x16xf32>, vector<16x128xf32>, vector<16x128xf32> -> vector<16x128xf32>
    %27 = vector.extract_strided_slice %21 {offsets = [32, 0], sizes = [16, 128], strides = [1, 1]} : vector<80x128xf32> to vector<16x128xf32>
    %cst_16 = arith.constant dense<0.000000e+00> : vector<16x128xf32>
    %28 = tpu.matmul %22, %27, %cst_16 {dimension_numbers = #tpu.dot_dimension_numbers<[1], [0], [0], [1], [0, 0, 1, 1], [], []>} : vector<16x16xf32>, vector<16x128xf32>, vector<16x128xf32> -> vector<16x128xf32>
    %29 = vector.extract_strided_slice %21 {offsets = [48, 0], sizes = [16, 128], strides = [1, 1]} : vector<80x128xf32> to vector<16x128xf32>
    %cst_17 = arith.constant dense<0.000000e+00> : vector<16x128xf32>
    %30 = tpu.matmul %22, %29, %cst_17 {dimension_numbers = #tpu.dot_dimension_numbers<[1], [0], [0], [1], [0, 0, 1, 1], [], []>} : vector<16x16xf32>, vector<16x128xf32>, vector<16x128xf32> -> vector<16x128xf32>
    %31 = vector.extract_strided_slice %21 {offsets = [64, 0], sizes = [16, 128], strides = [1, 1]} : vector<80x128xf32> to vector<16x128xf32>
    %cst_18 = arith.constant dense<0.000000e+00> : vector<16x128xf32>
    %32 = tpu.matmul %22, %31, %cst_18 {dimension_numbers = #tpu.dot_dimension_numbers<[1], [0], [0], [1], [0, 0, 1, 1], [], []>} : vector<16x16xf32>, vector<16x128xf32>, vector<16x128xf32> -> vector<16x128xf32>
    %33 = arith.mulf %24, %24 : vector<16x128xf32>
    %34 = arith.mulf %26, %26 : vector<16x128xf32>
    %35 = arith.mulf %24, %26 : vector<16x128xf32>
    %36 = arith.subf %28, %33 : vector<16x128xf32>
    %37 = arith.subf %30, %34 : vector<16x128xf32>
    %38 = arith.subf %32, %35 : vector<16x128xf32>
    %cst_19 = arith.constant 2.000000e+00 : f32
    %39 = vector.broadcast %cst_19 : f32 to vector<16x128xf32>
    %40 = arith.mulf %39, %35 : vector<16x128xf32>
    %cst_20 = arith.constant 9.99999974E-5 : f32
    %41 = vector.broadcast %cst_20 : f32 to vector<16x128xf32>
    %42 = arith.addf %40, %41 : vector<16x128xf32>
    %cst_21 = arith.constant 2.000000e+00 : f32
    %43 = vector.broadcast %cst_21 : f32 to vector<16x128xf32>
    %44 = arith.mulf %43, %38 : vector<16x128xf32>
    %cst_22 = arith.constant 8.99999984E-4 : f32
    %45 = vector.broadcast %cst_22 : f32 to vector<16x128xf32>
    %46 = arith.addf %44, %45 : vector<16x128xf32>
    %47 = arith.mulf %42, %46 : vector<16x128xf32>
    %48 = arith.addf %33, %34 : vector<16x128xf32>
    %cst_23 = arith.constant 9.99999974E-5 : f32
    %49 = vector.broadcast %cst_23 : f32 to vector<16x128xf32>
    %50 = arith.addf %48, %49 : vector<16x128xf32>
    %51 = arith.addf %36, %37 : vector<16x128xf32>
    %cst_24 = arith.constant 8.99999984E-4 : f32
    %52 = vector.broadcast %cst_24 : f32 to vector<16x128xf32>
    %53 = arith.addf %51, %52 : vector<16x128xf32>
    %54 = arith.mulf %50, %53 : vector<16x128xf32>
    %55 = tpu.reciprocal %54 {approx = true} : vector<16x128xf32> -> vector<16x128xf32>
    %56 = arith.mulf %47, %55 : vector<16x128xf32>
    %c0_25 = arith.constant 0 : index
    %c0_26 = arith.constant 0 : index
    %57 = vector.load %arg7[%c0_25, %c0_26] : memref<16x128xf32, #tpu.memory_space<vmem>>, vector<16x128xf32>
    %cst_27 = arith.constant -2.000000e-01 : f32
    %58 = vector.broadcast %cst_27 : f32 to vector<16x128xf32>
    %59 = arith.mulf %58, %56 : vector<16x128xf32>
    %60 = arith.addf %57, %59 : vector<16x128xf32>
    %c0_28 = arith.constant 0 : index
    %c0_29 = arith.constant 0 : index
    %61 = vector.load %arg7[%c0_28, %c0_29] : memref<16x128xf32, #tpu.memory_space<vmem>>, vector<16x128xf32>
    tpu.vector_store %arg7[%c0_28, %c0_29], %60 {strides = array<i32>} : memref<16x128xf32, #tpu.memory_space<vmem>>, vector<16x128xf32>,
    %c0_i32_30 = arith.constant 0 : i32
    %62 = arith.cmpi eq, %arg1, %c0_i32_30 : i32
    %63 = arith.extui %62 : i1 to i32
    %c0_i32_31 = arith.constant 0 : i32
    %64 = arith.cmpi ne, %63, %c0_i32_31 : i32
    scf.if %64 {
      %c0_32 = arith.constant 0 : index
      %c0_33 = arith.constant 0 : index
      %65 = vector.load %arg7[%c0_32, %c0_33] : memref<16x128xf32, #tpu.memory_space<vmem>>, vector<16x128xf32>
      %66 = vector.shape_cast %65 : vector<16x128xf32> to vector<1x16x128xf32>
      %cst_34 = arith.constant dense<0.000000e+00> : vector<1xf32>
      %67 = vector.multi_reduction <add>, %66, %cst_34 [1, 2] : vector<1x16x128xf32> to vector<1xf32>
      %68 = vector.shape_cast %67 : vector<1xf32> to vector<1x1x1xf32>
      %69 = vector.extract %68[0, 0, 0] : f32 from vector<1x1x1xf32>
      %cst_35 = arith.constant 4.8828125E-4 : f32
      %70 = arith.mulf %69, %cst_35 : f32
      %71 = vector.broadcast %70 : f32 to vector<8x128xf32>
      %c0_36 = arith.constant 0 : index
      %c0_37 = arith.constant 0 : index
      %72 = vector.load %arg6[%c0_36, %c0_37] : memref<8x128xf32, #tpu.memory_space<vmem>>, vector<8x128xf32>
      tpu.vector_store %arg6[%c0_36, %c0_37], %71 {strides = array<i32>} : memref<8x128xf32, #tpu.memory_space<vmem>>, vector<8x128xf32>,
    } else {
    }
    return
  }
  func.func @transform_0(%arg0: i32, %arg1: i32) -> (i32, i32) {
    %c1_i32 = arith.constant 1 : i32
    %0 = arith.muli %arg0, %c1_i32 : i32
    %1 = arith.addi %0, %arg1 : i32
    %c0_i32 = arith.constant 0 : i32
    %c0_i32_0 = arith.constant 0 : i32
    return %1, %c0_i32 : i32, i32
  }
  func.func @transform_1(%arg0: i32, %arg1: i32) -> (i32, i32) {
    %c1_i32 = arith.constant 1 : i32
    %0 = arith.muli %arg0, %c1_i32 : i32
    %1 = arith.addi %0, %arg1 : i32
    %c0_i32 = arith.constant 0 : i32
    %c0_i32_0 = arith.constant 0 : i32
    return %1, %c0_i32 : i32, i32
  }
  func.func @transform_2(%arg0: i32, %arg1: i32) -> (i32, i32) {
    %c0_i32 = arith.constant 0 : i32
    %c0_i32_0 = arith.constant 0 : i32
    %c0_i32_1 = arith.constant 0 : i32
    return %c0_i32, %c0_i32_0 : i32, i32
  }
  func.func @transform_3(%arg0: i32, %arg1: i32) -> (i32, i32) {
    %c0_i32 = arith.constant 0 : i32
    %c0_i32_0 = arith.constant 0 : i32
    %c0_i32_1 = arith.constant 0 : i32
    return %c0_i32, %c0_i32_0 : i32, i32
  }
  func.func @transform_4(%arg0: i32, %arg1: i32) -> (i32, i32) {
    %c0_i32 = arith.constant 0 : i32
    %c0_i32_0 = arith.constant 0 : i32
    return %arg0, %c0_i32 : i32, i32
  }
}

</mosaic_0001>

<bundles_post_ra>
// kernel: tpu_custom_call.1
= control target key start
LH: loop header
LB: loop body
LE: loop exit
PB: predicated region body
PF: predicated region fallthrough
CT: control target
= control target key end

     0   :  { %9 = vsyncpa [#allocation4], 0  ;;  %s1051_s0 = inlined_call_operand.hbm [shape: f32[16,128], index: 0, kind: input, shape index: {}]   ;;  %s1052_s1 = inlined_call_operand.hbm [shape: f32[16,128], index: 1, kind: input, shape index: {}]   ;;  %s1053_s2 = inlined_call_operand.hbm [shape: f32[128,128], index: 2, kind: input, shape index: {}]   ;;  %s1054_s3 = inlined_call_operand.hbm [shape: f32[16,16], index: 3, kind: input, shape index: {}]   ;;  %s1055_s4 = inlined_call_operand.hbm [shape: f32[8,128], index: 4, kind: output, shape index: {}]  }
   0x1   :  { %10 = vsyncpa [#allocation7], 0 }
   0x2   :  { %11 = vsyncpa [#allocation10], 0 }
   0x3   :  { %12 = vsyncpa [#allocation5], 0  ;;  %s972_s15 = smov [#allocation6]   ;;  %s973_s17 = smov [#allocation3]  }
   0x4   :  { %s38_s16 = sshll.u32 %s972_s15, 4  ;;  %s22_s18 = sshll.u32 %s973_s17, 4  ;;  %s39_s16 = int_to_ptr.vmem [resolvable:$true] %s38_s16  ;;  %s23_s18 = int_to_ptr.vmem [resolvable:$true] %s22_s18 }
   0x5   :  { %s872_s19 = scalar_lea.vmem %s39_s16, 256  ;;  %p877_p1 = scmp.lt.s32.totalorder %s39_s16, %s39_s16 }
   0x6   :  { %p873_p0 = scmp.ne.s32.totalorder %s39_s16, %s872_s19  ;;  %p878_p2 = scmp.lt.s32.totalorder %s872_s19, %s872_s19 }
   0x8   :  { %p879_p3 = por %p878_p2, %p877_p1 }
   0xa   :  { %p880_p4 = pnand %p879_p3, %p873_p0 }
   0xc   :  { %883 = shalt.err (!%p880_p4)
}
   0xd   :  { %s974_s20 = smov 128   ;;  %s975_s21 = smov 8  }
   0xe   :  { %44 = dma.hbm_to_vmem [thread:$0]  %s1052_s1, 256, %s39_s16, [#allocation7], %s974_s20, %s974_s20, %s975_s21  }
   0xf   :  { %s892_s24 = scalar_lea.vmem %s23_s18, 256  ;;  %p897_p6 = scmp.lt.s32.totalorder %s23_s18, %s23_s18 }
  0x10   :  { %p893_p5 = scmp.ne.s32.totalorder %s23_s18, %s892_s24  ;;  %p898_p7 = scmp.lt.s32.totalorder %s892_s24, %s892_s24 }
  0x12   :  { %p899_p8 = por %p898_p7, %p897_p6 }
  0x14   :  { %p900_p9 = pnand %p899_p8, %p893_p5 }
  0x16   :  { %903 = shalt.err (!%p900_p9)
}
  0x17   :  { %28 = dma.hbm_to_vmem [thread:$0]  %s1051_s0, 256, %s23_s18, [#allocation4], %s974_s20, %s974_s20, %s975_s21  }
  0x18   :  { %s976_s27 = smov [#allocation8]   ;;  %s977_s29 = smov [#allocation9]  }
  0x19   :  { %s50_s28 = sshll.u32 %s976_s27, 4  ;;  %s62_s30 = sshll.u32 %s977_s29, 4  ;;  %s51_s28 = int_to_ptr.vmem [resolvable:$true] %s50_s28  ;;  %s63_s30 = int_to_ptr.vmem [resolvable:$true] %s62_s30 }
  0x1a   :  { %s912_s1 = scalar_lea.vmem %s51_s28, 2048  ;;  %p917_p11 = scmp.lt.s32.totalorder %s51_s28, %s51_s28 }
  0x1b   :  { %p913_p10 = scmp.ne.s32.totalorder %s51_s28, %s912_s1  ;;  %p918_p12 = scmp.lt.s32.totalorder %s912_s1, %s912_s1 }
  0x1d   :  { %p919_p13 = por %p918_p12, %p917_p11 }
  0x1f   :  { %p920_p0 = pnand %p919_p13, %p913_p10 }
  0x21   :  { %923 = shalt.err (!%p920_p0)
}
  0x22   :  { %56 = dma.hbm_to_vmem [thread:$0]  %s1053_s2, 2048, %s51_s28, [#allocation7], %s974_s20, %s974_s20, %s975_s21  }
  0x23   :  { %s932_s0 = scalar_lea.vmem %s63_s30, 256  ;;  %p937_p2 = scmp.lt.s32.totalorder %s63_s30, %s63_s30 }
  0x24   :  { %p933_p1 = scmp.ne.s32.totalorder %s63_s30, %s932_s0  ;;  %p938_p3 = scmp.lt.s32.totalorder %s932_s0, %s932_s0 }
  0x26   :  { %p939_p4 = por %p938_p3, %p937_p2 }
  0x28   :  { %p940_p5 = pnand %p939_p4, %p933_p1 }
  0x2a   :  { %943 = shalt.err (!%p940_p5)
}
  0x2b   :  { %68 = dma.hbm_to_vmem [thread:$0]  %s1054_s3, 256, %s63_s30, [#allocation10], %s974_s20, %s974_s20, %s975_s21  }
  0x2c   :  { %964 = dma.done.wait [#allocation4], 256  }
  0x2d   :  { %965 = vsyncadd [#allocation4], 4294967040 }
  0x2e   :  { %966 = dma.done.wait [#allocation7], 2304  }
  0x2f   :  { %967 = vsyncadd [#allocation7], 4294964992 }
  0x30   :  { %968 = dma.done.wait [#allocation10], 256  }
  0x31   :  { %969 = vsyncadd [#allocation10], 4294967040  ;;  %v134_v0 = vld [vmem:[#allocation8 + $0x78] sm:$0xff]  ;;  %v133_v1 = vld [vmem:[#allocation8 + $0x70] sm:$0xff]  ;;  %vm252_vm0 = vcmask 130048   ;;  %s978_s2 = smov [#allocation11]  }
  0x32   :  { %769 = vmatprep.subr.mxu0 %v134_v0  ;;  %v132_v2 = vld [vmem:[#allocation8 + $0x68] sm:$0xff]  ;;  %v131_v3 = vld [vmem:[#allocation8 + $0x60] sm:$0xff]  ;;  %v130_v4 = vld [vmem:[#allocation8 + $0x58] sm:$0xff]  ;;  %s702_s3 = sshll.u32 %s978_s2, 4  ;;  %s703_s3 = int_to_ptr.vmem [resolvable:$true] %s702_s3 }
  0x33   :  { %770 = vmatpush3.msra.mxu0 %v134_v0  ;;  %v91_v5 = vld [vmem:[#allocation3] sm:$0xff]  ;;  %v92_v6 = vld [vmem:[#allocation3 + $0x8] sm:$0xff]  ;;  %v93_v7 = vld [vmem:[#allocation6] sm:$0xff]  ;;  %s944_s11 = scalar_lea.vmem %s703_s3, 128  ;;  %p949_p7 = scmp.lt.s32.totalorder %s703_s3, %s703_s3 }
  0x34   :  { %771 = vmatprep.subr.mxu0 %v133_v1  ;;  %801 = vmatprep.mubr.f32.mxu0 %v91_v5  ;;  %v94_v8 = vld [vmem:[#allocation6 + $0x8] sm:$0xff]  ;;  %v1028_v9 = vsub.f32 %v91_v5, %v93_v7  ;;  %v129_v11 = vld [vmem:[#allocation8 + $0x50] sm:$0xff]  ;;  %v128_v12 = vld [vmem:[#allocation8 + $0x48] sm:$0xff]  ;;  %v113_v22 = vmul.f32 %v91_v5, %v91_v5  ;;  %v114_v23 = vmul.f32 %v92_v6, %v92_v6  ;;  %p945_p6 = scmp.ne.s32.totalorder %s703_s3, %s944_s11  ;;  %p950_p8 = scmp.lt.s32.totalorder %s944_s11, %s944_s11 }
  0x35   :  { %772 = vmatpush3.msra.mxu0 %v133_v1  ;;  %v1030_v10 = vsub.f32 %v92_v6, %v94_v8  ;;  %v127_v13 = vld [vmem:[#allocation8 + $0x40] sm:$0xff]  ;;  %v126_v14 = vld [vmem:[#allocation8 + $0x38] sm:$0xff]  ;;  %v125_v15 = vld [vmem:[#allocation8 + $0x30] sm:$0xff]  ;;  %v115_v24 = vmul.f32 %v93_v7, %v93_v7  ;;  %v116_v25 = vmul.f32 %v94_v8, %v94_v8  ;;  %v117_v26 = vmul.f32 %v93_v7, %v91_v5 }
  0x36   :  { %773 = vmatprep.subr.mxu0 %v132_v2  ;;  %v124_v16 = vld [vmem:[#allocation8 + $0x28] sm:$0xff]  ;;  %v123_v17 = vld [vmem:[#allocation8 + $0x20] sm:$0xff]  ;;  %v122_v18 = vld [vmem:[#allocation8 + $0x18] sm:$0xff]  ;;  %v118_v27 = vmul.f32 %v94_v8, %v92_v6  ;;  %p951_p9 = por %p950_p8, %p949_p7 }
  0x37   :  { %774 = vmatpush3.msra.mxu0 %v132_v2  ;;  %v121_v19 = vld [vmem:[#allocation8 + $0x10] sm:$0xff]  ;;  %v120_v20 = vld [vmem:[#allocation8 + $0x8] sm:$0xff]  ;;  %v119_v21 = vld [vmem:[#allocation8] sm:$0xff] }
  0x38   :  { %775 = vmatprep.subr.mxu0 %v131_v3  ;;  %v250_v28 = vld [vmem:[#allocation9] sm:$0xff]  ;;  %v251_v31 = vld [vmem:[#allocation9 + $0x8] sm:$0xff]  ;;  %p952_p10 = pnand %p951_p9, %p945_p6 }
  0x39   :  { %776 = vmatpush3.msra.mxu0 %v131_v3  ;;  %820 = vmatprep.mubr.msk.f32.mxu1 %vm252_vm0, %v250_v28 }
  0x3a   :  { %777 = vmatprep.subr.mxu0 %v130_v4 }
  0x3b   :  { %778 = vmatpush3.msra.mxu0 %v130_v4 }
  0x3c   :  { %779 = vmatprep.subr.mxu0 %v129_v11 }
  0x3d   :  { %780 = vmatpush3.msra.mxu0 %v129_v11 }
  0x3e   :  { %781 = vmatprep.subr.mxu0 %v128_v12 }
  0x3f   :  { %782 = vmatpush3.msra.mxu0 %v128_v12 }
  0x40   :  { %783 = vmatprep.subr.mxu0 %v127_v13 }
  0x41   :  { %784 = vmatpush3.msra.mxu0 %v127_v13  ;;  %v99_v13 = vmul.f32 %v1028_v9, %v1028_v9 }
  0x42   :  { %785 = vmatprep.subr.mxu0 %v126_v14 }
  0x43   :  { %786 = vmatpush3.msra.mxu0 %v126_v14  ;;  %v100_v14 = vmul.f32 %v1030_v10, %v1030_v10 }
  0x44   :  { %787 = vmatprep.subr.mxu0 %v125_v15 }
  0x45   :  { %788 = vmatpush3.msra.mxu0 %v125_v15  ;;  %v103_v15 = vand.u32 2147483647, %v1028_v9 }
  0x46   :  { %789 = vmatprep.subr.mxu0 %v124_v16 }
  0x47   :  { %790 = vmatpush3.msra.mxu0 %v124_v16 }
  0x48   :  { %791 = vmatprep.subr.mxu0 %v123_v17 }
  0x49   :  { %792 = vmatpush3.msra.mxu0 %v123_v17 }
  0x4a   :  { %793 = vmatprep.subr.mxu0 %v122_v18 }
  0x4b   :  { %794 = vmatpush3.msra.mxu0 %v122_v18  ;;  %v104_v18 = vand.u32 2147483647, %v1030_v10 }
  0x4c   :  { %795 = vmatprep.subr.mxu0 %v121_v19 }
  0x4d   :  { %796 = vmatpush3.msra.mxu0 %v121_v19 }
  0x4e   :  { %797 = vmatprep.subr.mxu0 %v120_v20 }
  0x4f   :  { %798 = vmatpush3.msra.mxu0 %v120_v20 }
  0x50   :  { %799 = vmatprep.subr.mxu0 %v119_v21 }
  0x51   :  { %800 = vmatpush3.msra.mxu0 %v119_v21  ;;  %v101_v21 = vmul.f32 0.5, %v99_v13 }
  0x52   :  { %802 = vmatmul.mubr.f32.vlgmr.msra.gmra.mxu0 %v92_v6 }
  0x53   :  { %804 = vmatprep.mubr.f32.mxu0 %v93_v7 }
  0x56   :  { %805 = vmatmul.mubr.f32.gmra.mxu0 %v94_v8 }
  0x57   :  { %807 = vmatprep.mubr.f32.mxu0 %v113_v22  ;;  %v102_v22 = vmul.f32 0.5, %v100_v14 }
  0x5a   :  { %808 = vmatmul.mubr.f32.gmra.mxu0 %v114_v23 }
  0x5b   :  { %810 = vmatprep.mubr.f32.mxu0 %v115_v24 }
  0x5e   :  { %811 = vmatmul.mubr.f32.gmra.mxu0 %v116_v25  ;;  %v105_v25 = vmul.f32 0.3, %v103_v15 }
  0x5f   :  { %813 = vmatprep.mubr.f32.mxu0 %v117_v26  ;;  %v106_v26 = vmul.f32 0.3, %v104_v18 }
  0x62   :  { %814 = vmatmul.mubr.f32.gmra.mxu0 %v118_v27 }
 0x112   :  { %v803_v29 = vpop.f32.mrf.mxu0 }
 0x113   :  { %816 = vmatprep.subr.mxu1 %v803_v29 }
 0x114   :  { %v201_v30 = vpop.f32.mrf.mxu0  ;;  %817 = vmatpush3.msra.mxu1 %v803_v29 }
 0x115   :  { %818 = vmatprep.subr.mxu1 %v201_v30 }
 0x116   :  { %v806_v32 = vpop.f32.mrf.mxu0  ;;  %819 = vmatpush3.msra.mxu1 %v201_v30 }
 0x117   :  { %821 = vmatmul.mubr.msk.f32.vlgmr.msra.gmra.mxu1 %vm252_vm0, %v251_v31  ;;  %823 = vmatprep.subr.mxu1 %v806_v32 }
 0x118   :  { %v211_v33 = vpop.f32.mrf.mxu0  ;;  %824 = vmatpush3.msra.mxu1 %v806_v32  ;;  %827 = vmatprep.mubr.msk.f32.mxu1 %vm252_vm0, %v250_v28  ;;  %v108_v32 = vadd.f32 %v106_v26, %v102_v22 }
 0x119   :  { %825 = vmatprep.subr.mxu1 %v211_v33 }
 0x11a   :  { %v809_v34 = vpop.f32.mrf.mxu0  ;;  %826 = vmatpush3.msra.mxu1 %v211_v33 }
 0x11b   :  { %828 = vmatmul.mubr.msk.f32.vlgmr.msra.gmra.mxu1 %vm252_vm0, %v251_v31  ;;  %830 = vmatprep.subr.mxu1 %v809_v34 }
 0x11c   :  { %v221_v35 = vpop.f32.mrf.mxu0  ;;  %831 = vmatpush3.msra.mxu1 %v809_v34  ;;  %834 = vmatprep.mubr.msk.f32.mxu1 %vm252_vm0, %v250_v28 }
 0x11d   :  { %832 = vmatprep.subr.mxu1 %v221_v35 }
 0x11e   :  { %v812_v36 = vpop.f32.mrf.mxu0  ;;  %833 = vmatpush3.msra.mxu1 %v221_v35 }
 0x11f   :  { %835 = vmatmul.mubr.msk.f32.vlgmr.msra.gmra.mxu1 %vm252_vm0, %v251_v31  ;;  %837 = vmatprep.subr.mxu1 %v812_v36 }
 0x120   :  { %v231_v37 = vpop.f32.mrf.mxu0  ;;  %838 = vmatpush3.msra.mxu1 %v812_v36  ;;  %841 = vmatprep.mubr.msk.f32.mxu1 %vm252_vm0, %v250_v28 }
 0x121   :  { %839 = vmatprep.subr.mxu1 %v231_v37 }
 0x122   :  { %v815_v38 = vpop.f32.mrf.mxu0  ;;  %840 = vmatpush3.msra.mxu1 %v231_v37 }
 0x123   :  { %842 = vmatmul.mubr.msk.f32.vlgmr.msra.gmra.mxu1 %vm252_vm0, %v251_v31  ;;  %844 = vmatprep.subr.mxu1 %v815_v38 }
 0x124   :  { %v241_v39 = vpop.f32.mrf.mxu0  ;;  %845 = vmatpush3.msra.mxu1 %v815_v38  ;;  %848 = vmatprep.mubr.msk.f32.mxu1 %vm252_vm0, %v250_v28 }
 0x125   :  { %846 = vmatprep.subr.mxu1 %v241_v39 }
 0x126   :  { %847 = vmatpush3.msra.mxu1 %v241_v39 }
 0x127   :  { %849 = vmatmul.mubr.msk.f32.vlgmr.msra.gmra.mxu1 %vm252_vm0, %v251_v31  ;;  %v107_v31 = vadd.f32 %v105_v25, %v101_v21 }
 0x1d7   :  { %v822_v40 = vpop.f32.mrf.mxu1 }
 0x1d8   :  { %v635_v47 = vmul.f32 %v822_v40, %v822_v40 }
 0x1d9   :  { %v325_v41 = vpop.f32.mrf.mxu1 }
 0x1da   :  { %v634_v50 = vmul.f32 %v325_v41, %v325_v41 }
 0x1db   :  { %v829_v42 = vpop.f32.mrf.mxu1 }
 0x1dc   :  { %v637_v45 = vmul.f32 %v829_v42, %v829_v42  ;;  %v639_v63 = vmul.f32 %v829_v42, %v822_v40 }
 0x1dd   :  { %v400_v43 = vpop.f32.mrf.mxu1 }
 0x1de   :  { %v636_v48 = vmul.f32 %v400_v43, %v400_v43  ;;  %v657_v51 = vadd.f32 %v637_v45, %v635_v47  ;;  %v638_v4 = vmul.f32 %v400_v43, %v325_v41  ;;  %v647_v11 = vmul.f32 2.0, %v639_v63 }
 0x1df   :  { %v836_v44 = vpop.f32.mrf.mxu1 }
 0x1e0   :  { %v641_v52 = vsub.f32 %v836_v44, %v635_v47  ;;  %v656_v55 = vadd.f32 %v636_v48, %v634_v50  ;;  %v659_v60 = vadd.f32 0.0001, %v657_v51  ;;  %v646_v16 = vmul.f32 2.0, %v638_v4 }
 0x1e1   :  { %v475_v46 = vpop.f32.mrf.mxu1  ;;  %v649_v19 = vadd.f32 0.0001, %v647_v11 }
 0x1e2   :  { %v640_v56 = vsub.f32 %v475_v46, %v634_v50  ;;  %v658_v0 = vadd.f32 0.0001, %v656_v55  ;;  %v648_v23 = vadd.f32 0.0001, %v646_v16 }
 0x1e3   :  { %v843_v49 = vpop.f32.mrf.mxu1 }
 0x1e4   :  { %v643_v53 = vsub.f32 %v843_v49, %v637_v45 }
 0x1e5   :  { %v550_v54 = vpop.f32.mrf.mxu1 }
 0x1e6   :  { %v661_v57 = vadd.f32 %v643_v53, %v641_v52  ;;  %v642_v58 = vsub.f32 %v550_v54, %v636_v48 }
 0x1e7   :  { %v850_v59 = vpop.f32.mrf.mxu1 }
 0x1e8   :  { %v663_v61 = vadd.f32 0.0009, %v661_v57  ;;  %v660_v62 = vadd.f32 %v642_v58, %v640_v56  ;;  %v645_v6 = vsub.f32 %v850_v59, %v639_v63 }
 0x1e9   :  { %v625_v3 = vpop.f32.mrf.mxu1 }
 0x1ea   :  { %v665_v1 = vmul.f32 %v663_v61, %v659_v60  ;;  %v662_v2 = vadd.f32 0.0009, %v660_v62  ;;  %v644_v7 = vsub.f32 %v625_v3, %v638_v4  ;;  %v651_v8 = vmul.f32 2.0, %v645_v6 }
 0x1ec   :  { %860 = vrcp.f32 %v665_v1  ;;  %v664_v5 = vmul.f32 %v662_v2, %v658_v0  ;;  %v650_v12 = vmul.f32 2.0, %v644_v7  ;;  %v653_v17 = vadd.f32 0.0009, %v651_v8 }
 0x1ee   :  { %862 = vrcp.f32 %v664_v5  ;;  %v652_v20 = vadd.f32 0.0009, %v650_v12  ;;  %v655_v24 = vmul.f32 %v653_v17, %v649_v19 }
 0x1f0   :  { %v654_v28 = vmul.f32 %v652_v20, %v648_v23 }
 0x1f9   :  { %v861_v27 = vpop.eup %860 }
 0x1fa   :  { %v669_v29 = vmul.f32 %v861_v27, %v655_v24 }
 0x1fb   :  { %v863_v30 = vpop.eup %862 }
 0x1fc   :  { %v668_v33 = vmul.f32 %v863_v30, %v654_v28  ;;  %v673_v9 = vmul.f32 -0.2, %v669_v29 }
 0x1fe   :  { %v672_v34 = vmul.f32 -0.2, %v668_v33  ;;  %v675_v36 = vadd.f32 %v673_v9, %v108_v32 }
 0x200   :  { %v674_v35 = vadd.f32 %v672_v34, %v107_v31 }
 0x202   :  { %v683_v10 = vadd.f32 %v675_v36, %v674_v35 }
 0x204   :  { %684 = vadd.xlane.f32.xlu0 %v683_v10 }
 0x28d   :  { %v685_v37 = vpop.xlane.xlu0 %684 }
 0x28e   :  { %v686_v38 = vrot.slane %v685_v37, 4 }
 0x290   :  { %v687_v39 = vadd.f32 %v686_v38, %v685_v37 }
 0x292   :  { %v688_v40 = vrot.slane %v687_v39, 2 }
 0x294   :  { %v689_v41 = vadd.f32 %v688_v40, %v687_v39 }
 0x296   :  { %v690_v42 = vrot.slane %v689_v41, 1 }
 0x298   :  { %v691_v43 = vadd.f32 %v690_v42, %v689_v41 }
 0x29a   :  { %851 = vpush %v691_v43 }
 0x2cb   :  { %s852_s9 = spop %851 }
 0x2cc   :  { %s693_s10 = smul.f32 0.00048828125, %s852_s9 }
 0x2ce   :  { %v694_v44 = vstv %s693_s10 }
 0x2cf   :  { %695 = vst [vmem:[#allocation11] sm:$0xff] %v694_v44 }
 0x2d0   :  { %955 = shalt.err (!%p952_p10)
}
 0x2d1   :  { %705 = dma.vmem_to_hbm [thread:$0]  %s703_s3, 128, %s1055_s4, [#allocation5]  }
 0x2d2   :  { %970 = dma.done.wait [#allocation5], 128  }
 0x2d3   :  { %971 = vsyncadd [#allocation5], 4294967168 }
 0x2d4   :  { %709 = vsyncpa [#allocation4], 1 }
 0x2d5   :  { %710 = vsyncpa [#allocation7], 1 }
 0x2d6   :  { %711 = vsyncpa [#allocation10], 1 }
 0x2d7   :  { %712 = vsyncpa [#allocation5], 1 }

</bundles_post_ra>
